<compile_context>
chip_gen: v6e
topology: v6e:2x2x1
jax: 0.10.0
libtpu: 0.0.40
codegen_flags: <defaults>
</compile_context>

<pallas_src>
import jax
import jax.numpy as jnp
from jax.experimental import pallas as pl
from jax.experimental.pallas import tpu as pltpu

HIDDEN = 128          # fixed by the module: nn.Linear(input_dim, 128)
TEMPERATURE = 0.5     # fixed by the module
LANE = 128
SUBLANE = 8


def _round_up(a, m):
    return ((a + m - 1) // m) * m


def _difficulty_kernel(x_ref, w1_ref, b1_ref, w2_ref, b2_ref, o_ref):
    # Per grid step:
    #   x:  (TB, Dp)      w1: (Dp, 128)     b1: (1, 128)
    #   w2: (1, 128)  [row, pre-scaled by 1/T]
    #   b2: (1, 1)    [SMEM scalar, pre-scaled by 1/T]
    #   o:  (TB, 1)
    h = jnp.dot(x_ref[...], w1_ref[...], preferred_element_type=jnp.float32)
    h = jnp.maximum(h + b1_ref[...], 0.0)                       # bias + ReLU (VPU)
    # Second linear has N=1 -> avoid a degenerate MXU matmul; VPU multiply +
    # XLU cross-lane reduction (both slots have slack under the MXU/DMA path).
    logits = jnp.sum(h * w2_ref[...], axis=-1, keepdims=True)   # (TB, 1)
    o_ref[...] = (logits + b2_ref[0, 0]).astype(o_ref.dtype)


def _vmem_capacity_bytes():
    try:
        return int(pltpu.get_tpu_info().vmem_capacity_bytes)
    except Exception:
        return 64 << 20   # conservative fallback: v7x per-TensorCore VMEM


def difficulty_estimator(x, w1, b1, w2, b2, *, temperature=TEMPERATURE,
                         max_block_b=2048):
    """logits = (relu(x @ w1 + b1) @ w2 + b2) / temperature.

    x:  (B, D) float32
    w1: (D, 128)   (first nn.Linear weight, pre-transposed to x @ W layout)
    b1: (128,) or (1, 128)
    w2: (128, 1) or (128,)
    b2: scalar, (1,) or (1, 1)
    Returns (B, 1) float32.
    """
    B, D = x.shape
    H = w1.shape[1]

    # ---- fold temperature into the 2nd-layer params (exact trace-time algebra) --
    inv_t = jnp.float32(1.0 / temperature)
    w2_row = (jnp.reshape(w2, (1, H)) * inv_t).astype(jnp.float32)   # (1, 128)
    b2_s = (jnp.reshape(b2, (1, 1)) * inv_t).astype(jnp.float32)     # (1, 1) SMEM
    b1_row = jnp.reshape(b1, (1, H)).astype(jnp.float32)

    # ---- feature axis must be a multiple of the 128-lane width -----------------
    # Zero-padding x AND w1 is numerically exact, but costs one extra HBM round
    # trip of x: prefer producing x with D % 128 == 0 upstream.  Do NOT replace
    # this with a partial feature block (garbage lanes * zero w1 rows -> NaN*0).
    Dp = _round_up(D, LANE)
    if Dp != D:
        x = jnp.pad(x, ((0, 0), (0, Dp - D)))
        w1 = jnp.pad(w1, ((0, Dp - D), (0, 0)))
    x = x.astype(jnp.float32)
    w1 = w1.astype(jnp.float32)

    # ---- batch tile from the per-core VMEM budget (no batch padding of x) ------
    vmem_cap = _vmem_capacity_bytes()
    budget = int(vmem_cap * 0.7)                       # headroom for compiler scratch
    weight_bytes = 2 * (Dp * H + 2 * H) * 4            # weights, budgeted double-buffered
    row_bytes = Dp * 4
    tb_vmem = (budget - weight_bytes) // (2 * row_bytes)   # double-buffered x tile
    TB = int(max(SUBLANE, min(tb_vmem, max_block_b)))
    TB = (TB // SUBLANE) * SUBLANE
    TB = min(TB, _round_up(B, SUBLANE))                # one partial block if B is tiny
    if B >= 8 * 256:
        # keep >= ~8 grid steps so the x DMA overlaps compute (and v7x megacore
        # has work for both TensorCores), but never shrink below 256 rows.
        TB = min(TB, max(256, _round_up(pl.cdiv(B, 8), SUBLANE)))
    TB = max(SUBLANE, TB)

    # Ragged last block: OOB input rows contain garbage, their output rows are
    # masked on writeback; rows are independent so valid rows stay exact.
    grid = (pl.cdiv(B, TB),)

    # TODO(synk): for very large D (>= ~4-8K) add a second "arbitrary" K grid axis
    # with a (TB, H) f32 accumulator so TB stays large without blowing VMEM.

    vmem_need = 2 * TB * row_bytes + weight_bytes + 2 * TB * 4
    vmem_limit = int(min(vmem_cap, max(vmem_need + (8 << 20), 32 << 20)))

    cost = pl.CostEstimate(
        flops=2 * B * Dp * H + 2 * B * H,
        transcendentals=0,
        bytes_accessed=B * Dp * 4 + Dp * H * 4 + 2 * H * 4 + B * 4,
    )

    out = pl.pallas_call(
        _difficulty_kernel,
        out_shape=jax.ShapeDtypeStruct((B, 1), jnp.float32),
        grid_spec=pltpu.PrefetchScalarGridSpec(
            num_scalar_prefetch=0,
            grid=grid,
            in_specs=[
                pl.BlockSpec((TB, Dp), lambda i: (i, 0)),    # x tile (pipelined)
                pl.BlockSpec((Dp, H), lambda i: (0, 0)),     # w1 (VMEM resident)
                pl.BlockSpec((1, H), lambda i: (0, 0)),      # b1 (resident)
                pl.BlockSpec((1, H), lambda i: (0, 0)),      # w2 row (resident)
                pl.BlockSpec(memory_space=pltpu.MemorySpace.SMEM),  # b2 scalar
            ],
            out_specs=pl.BlockSpec((TB, 1), lambda i: (i, 0)),
        ),
        compiler_params=pltpu.CompilerParams(
            dimension_semantics=("parallel",),   # megacore-shard batch on v7x
            vmem_limit_bytes=vmem_limit,
        ),
        cost_estimate=cost,
    )(x, w1, b1_row, w2_row, b2_s)
    return out


def init_params(key, input_dim):
    """Deterministic synthetic parameters (PyTorch-like uniform fan-in init)."""
    k1, k2, k3, k4 = jax.random.split(key, 4)
    bound1 = 1.0 / jnp.sqrt(jnp.float32(input_dim))
    bound2 = 1.0 / jnp.sqrt(jnp.float32(HIDDEN))
    w1 = jax.random.uniform(k1, (input_dim, HIDDEN), jnp.float32, -bound1, bound1)
    b1 = jax.random.uniform(k2, (HIDDEN,), jnp.float32, -bound1, bound1)
    w2 = jax.random.uniform(k3, (HIDDEN, 1), jnp.float32, -bound2, bound2)
    b2 = jax.random.uniform(k4, (1,), jnp.float32, -bound2, bound2)
    return w1, b1, w2, b2


def reference(x, w1, b1, w2, b2):
    h = jnp.maximum(x @ w1 + b1[None, :], 0.0)
    return (h @ w2 + b2[None, :]) / TEMPERATURE


if __name__ == "__main__":
    key = jax.random.PRNGKey(0)

    # Case 1: tiny ragged shapes -- feature pad (64 -> 128) + a single partial
    # batch block (13 rows inside a 16-row tile; garbage rows masked on store).
    B1, D1 = 13, 64
    k1, k2, key = jax.random.split(key, 3)
    x1 = jax.random.normal(k1, (B1, D1), jnp.float32)
    p1 = init_params(k2, D1)
    out1 = jax.block_until_ready(difficulty_estimator(x1, *p1))
    ref1 = reference(x1, *p1)
    assert out1.shape == (B1, 1)
    assert jnp.allclose(out1, ref1, atol=2e-3, rtol=2e-3), "case-1 mismatch"

    # Case 2: module-default feature dim with a ragged multi-block grid
    # (max_block_b caps TB so the cdiv grid + masked last block is exercised).
    B2, D2 = 100, 768
    k3, k4 = jax.random.split(key)
    x2 = jax.random.normal(k3, (B2, D2), jnp.float32)
    p2 = init_params(k4, D2)
    out2 = jax.block_until_ready(difficulty_estimator(x2, *p2, max_block_b=32))
    ref2 = reference(x2, *p2)
    assert out2.shape == (B2, 1)
    assert jnp.allclose(out2, ref2, atol=2e-3, rtol=2e-3), "case-2 mismatch"

    print("KERNEL_OK")
</pallas_src>

<mosaic_0001>
module attributes {stable_mosaic.version = 11 : i64} {
  func.func @_difficulty_kernel(%arg0: i32, %arg1: memref<16x128xf32, #tpu.memory_space<vmem>>, %arg2: memref<128x128xf32, #tpu.memory_space<vmem>>, %arg3: memref<1x128xf32, #tpu.memory_space<vmem>>, %arg4: memref<1x128xf32, #tpu.memory_space<vmem>>, %arg5: memref<1x1xf32, #tpu.memory_space<smem>>, %arg6: memref<16x1xf32, #tpu.memory_space<vmem>>) attributes {dimension_semantics = [#tpu.dimension_semantics<parallel>], iteration_bounds = array<i64: 1>, scalar_prefetch = 0 : i64, scratch_operands = 0 : i64, tpu.core_type = #tpu.core_type<tc>, window_params = [{transform_indices = @transform_0, window_bounds = array<i64: 16, 128>}, {pipeline_mode = #tpu.pipeline_mode<synchronous>, transform_indices = @transform_1, window_bounds = array<i64: 128, 128>}, {pipeline_mode = #tpu.pipeline_mode<synchronous>, transform_indices = @transform_2, window_bounds = array<i64: 1, 128>}, {pipeline_mode = #tpu.pipeline_mode<synchronous>, transform_indices = @transform_3, window_bounds = array<i64: 1, 128>}, {transform_indices = @transform_4, window_bounds = array<i64: 1, 1>}, {transform_indices = @transform_5, window_bounds = array<i64: 16, 1>}]} {
    %c0 = arith.constant 0 : index
    %c0_0 = arith.constant 0 : index
    %0 = vector.load %arg1[%c0, %c0_0] : memref<16x128xf32, #tpu.memory_space<vmem>>, vector<16x128xf32>
    %c0_1 = arith.constant 0 : index
    %c0_2 = arith.constant 0 : index
    %1 = vector.load %arg2[%c0_1, %c0_2] : memref<128x128xf32, #tpu.memory_space<vmem>>, vector<128x128xf32>
    %cst = arith.constant dense<0.000000e+00> : vector<16x128xf32>
    %2 = tpu.matmul %0, %1, %cst {dimension_numbers = #tpu.dot_dimension_numbers<[1], [0], [0], [1], [0, 0, 1, 1], [], []>} : vector<16x128xf32>, vector<128x128xf32>, vector<16x128xf32> -> vector<16x128xf32>
    %c0_3 = arith.constant 0 : index
    %c0_4 = arith.constant 0 : index
    %3 = vector.load %arg3[%c0_3, %c0_4] : memref<1x128xf32, #tpu.memory_space<vmem>>, vector<1x128xf32>
    %4 = vector.broadcast %3 : vector<1x128xf32> to vector<16x128xf32>
    %5 = arith.addf %2, %4 : vector<16x128xf32>
    %cst_5 = arith.constant 0.000000e+00 : f32
    %6 = vector.broadcast %cst_5 : f32 to vector<16x128xf32>
    %7 = arith.maximumf %5, %6 : vector<16x128xf32>
    %c0_6 = arith.constant 0 : index
    %c0_7 = arith.constant 0 : index
    %8 = vector.load %arg4[%c0_6, %c0_7] : memref<1x128xf32, #tpu.memory_space<vmem>>, vector<1x128xf32>
    %9 = vector.broadcast %8 : vector<1x128xf32> to vector<16x128xf32>
    %10 = arith.mulf %7, %9 : vector<16x128xf32>
    %cst_8 = arith.constant dense<0.000000e+00> : vector<16xf32>
    %11 = vector.multi_reduction <add>, %10, %cst_8 [1] : vector<16x128xf32> to vector<16xf32>
    %12 = vector.shape_cast %11 : vector<16xf32> to vector<16x1xf32>
    %c0_9 = arith.constant 0 : index
    %c0_10 = arith.constant 0 : index
    %13 = memref.load %arg5[%c0_9, %c0_10] : memref<1x1xf32, #tpu.memory_space<smem>>
    %14 = vector.broadcast %13 : f32 to vector<16x1xf32>
    %15 = arith.addf %12, %14 : vector<16x1xf32>
    %c0_11 = arith.constant 0 : index
    %c0_12 = arith.constant 0 : index
    %16 = vector.load %arg6[%c0_11, %c0_12] : memref<16x1xf32, #tpu.memory_space<vmem>>, vector<16x1xf32>
    tpu.vector_store %arg6[%c0_11, %c0_12], %15 {strides = array<i32>} : memref<16x1xf32, #tpu.memory_space<vmem>>, vector<16x1xf32>,
    return
  }
  func.func @transform_0(%arg0: i32) -> (i32, i32) {
    %c0_i32 = arith.constant 0 : i32
    %c0_i32_0 = arith.constant 0 : i32
    return %arg0, %c0_i32 : i32, i32
  }
  func.func @transform_1(%arg0: i32) -> (i32, i32) {
    %c0_i32 = arith.constant 0 : i32
    %c0_i32_0 = arith.constant 0 : i32
    %c0_i32_1 = arith.constant 0 : i32
    return %c0_i32, %c0_i32_0 : i32, i32
  }
  func.func @transform_2(%arg0: i32) -> (i32, i32) {
    %c0_i32 = arith.constant 0 : i32
    %c0_i32_0 = arith.constant 0 : i32
    %c0_i32_1 = arith.constant 0 : i32
    return %c0_i32, %c0_i32_0 : i32, i32
  }
  func.func @transform_3(%arg0: i32) -> (i32, i32) {
    %c0_i32 = arith.constant 0 : i32
    %c0_i32_0 = arith.constant 0 : i32
    %c0_i32_1 = arith.constant 0 : i32
    return %c0_i32, %c0_i32_0 : i32, i32
  }
  func.func @transform_4(%arg0: i32) -> (i32, i32) {
    %c0_i32 = arith.constant 0 : i32
    %c0_i32_0 = arith.constant 0 : i32
    %c0_i32_1 = arith.constant 0 : i32
    return %c0_i32, %c0_i32_0 : i32, i32
  }
  func.func @transform_5(%arg0: i32) -> (i32, i32) {
    %c0_i32 = arith.constant 0 : i32
    %c0_i32_0 = arith.constant 0 : i32
    return %arg0, %c0_i32 : i32, i32
  }
}

</mosaic_0001>

<bundles_post_ra>
// kernel: tpu_custom_call.1
= control target key start
LH: loop header
LB: loop body
LE: loop exit
PB: predicated region body
PF: predicated region fallthrough
CT: control target
= control target key end

     0   :  { %11 = vsyncpa [#allocation4], 0  ;;  %s335_s0 = inlined_call_operand.hbm [shape: f32[13,128], index: 0, kind: input, shape index: {}]   ;;  %s336_s1 = inlined_call_operand.hbm [shape: f32[128,128], index: 1, kind: input, shape index: {}]   ;;  %s337_s2 = inlined_call_operand.vmem [shape: f32[1,128], index: 2, kind: input, shape index: {}]   ;;  %s338_s3 = inlined_call_operand.vmem [shape: f32[1,128], index: 3, kind: input, shape index: {}]   ;;  %s339_s4 = inlined_call_operand.<no memory space> [shape: f32[1,1], index: 4, kind: input, shape index: {}]   ;;  %s340_s5 = inlined_call_operand.vmem [shape: f32[13,1], index: 5, kind: output, shape index: {}]  }
   0x1   :  { %12 = vsyncpa [#allocation6], 0  ;;  %s280_s18 = smov [#allocation3]  }
   0x2   :  { %s18_s19 = sshll.u32 %s280_s18, 4  ;;  %s19_s19 = int_to_ptr.vmem [resolvable:$true] %s18_s19 }
   0x3   :  { %s244_s20 = scalar_lea.vmem %s19_s19, 256  ;;  %p249_p1 = scmp.lt.s32.totalorder %s19_s19, %s19_s19 }
   0x4   :  { %p245_p0 = scmp.ne.s32.totalorder %s19_s19, %s244_s20  ;;  %p250_p2 = scmp.lt.s32.totalorder %s244_s20, %s244_s20 }
   0x6   :  { %p251_p3 = por %p250_p2, %p249_p1 }
   0x8   :  { %p252_p4 = pnand %p251_p3, %p245_p0 }
   0xa   :  { %255 = shalt.err (!%p252_p4)
}
   0xb   :  { %s281_s21 = smov 128   ;;  %s282_s22 = smov 8  }
   0xc   :  { %24 = dma.hbm_to_vmem [thread:$0]  %s335_s0, 256, %s19_s19, [#allocation4], %s281_s21, %s281_s21, %s282_s22  }
   0xd   :  { %s283_s25 = smov [#allocation5]  }
   0xe   :  { %s30_s26 = sshll.u32 %s283_s25, 4  ;;  %s31_s26 = int_to_ptr.vmem [resolvable:$true] %s30_s26 }
   0xf   :  { %s264_s27 = scalar_lea.vmem %s31_s26, 2048  ;;  %p269_p6 = scmp.lt.s32.totalorder %s31_s26, %s31_s26 }
  0x10   :  { %p265_p5 = scmp.ne.s32.totalorder %s31_s26, %s264_s27  ;;  %p270_p7 = scmp.lt.s32.totalorder %s264_s27, %s264_s27 }
  0x12   :  { %p271_p8 = por %p270_p7, %p269_p6 }
  0x14   :  { %p272_p9 = pnand %p271_p8, %p265_p5 }
  0x16   :  { %275 = shalt.err (!%p272_p9)
}
  0x17   :  { %36 = dma.hbm_to_vmem [thread:$0]  %s336_s1, 2048, %s31_s26, [#allocation6], %s281_s21, %s281_s21, %s282_s22  }
  0x18   :  { %276 = dma.done.wait [#allocation4], 256  }
  0x19   :  { %277 = vsyncadd [#allocation4], 4294967040 }
  0x1a   :  { %278 = dma.done.wait [#allocation6], 2048  }
  0x1b   :  { %279 = vsyncadd [#allocation6], 4294965248  ;;  %v66_v0 = vld [vmem:[#allocation5 + $0x78] sm:$0xff]  ;;  %v65_v1 = vld [vmem:[#allocation5 + $0x70] sm:$0xff]  ;;  %v165_v28 = vstv %s339_s4  ;;  %vm168_vm0 = vcmask 7168  }
  0x1c   :  { %197 = vmatprep.subr.mxu0 %v66_v0  ;;  %v64_v2 = vld [vmem:[#allocation5 + $0x68] sm:$0xff]  ;;  %v63_v3 = vld [vmem:[#allocation5 + $0x60] sm:$0xff]  ;;  %v49_v4 = vld [vmem:[#allocation3] sm:$0xff] }
  0x1d   :  { %198 = vmatpush3.msra.mxu0 %v66_v0  ;;  %v62_v5 = vld [vmem:[#allocation5 + $0x58] sm:$0xff]  ;;  %229 = vmatprep.mubr.f32.mxu0 %v49_v4  ;;  %v61_v6 = vld [vmem:[#allocation5 + $0x50] sm:$0xff]  ;;  %v60_v7 = vld [vmem:[#allocation5 + $0x48] sm:$0xff] }
  0x1e   :  { %199 = vmatprep.subr.mxu0 %v65_v1  ;;  %v59_v8 = vld [vmem:[#allocation5 + $0x40] sm:$0xff]  ;;  %v58_v9 = vld [vmem:[#allocation5 + $0x38] sm:$0xff]  ;;  %v57_v10 = vld [vmem:[#allocation5 + $0x30] sm:$0xff] }
  0x1f   :  { %200 = vmatpush3.msra.mxu0 %v65_v1  ;;  %v56_v11 = vld [vmem:[#allocation5 + $0x28] sm:$0xff]  ;;  %v55_v12 = vld [vmem:[#allocation5 + $0x20] sm:$0xff]  ;;  %v54_v13 = vld [vmem:[#allocation5 + $0x18] sm:$0xff] }
  0x20   :  { %201 = vmatprep.subr.mxu0 %v64_v2  ;;  %v53_v14 = vld [vmem:[#allocation5 + $0x10] sm:$0xff]  ;;  %v52_v15 = vld [vmem:[#allocation5 + $0x8] sm:$0xff]  ;;  %v51_v16 = vld [vmem:[#allocation5] sm:$0xff] }
  0x21   :  { %202 = vmatpush3.msra.mxu0 %v64_v2  ;;  %v50_v17 = vld [vmem:[#allocation3 + $0x8] sm:$0xff]  ;;  %v177_v19 = vld [vmem:[%s337_s2] ss:$0 sm:$0xff] }
  0x22   :  { %203 = vmatprep.subr.mxu0 %v63_v3  ;;  %v178_v24 = vld [vmem:[%s338_s3] ss:$0 sm:$0xff] }
  0x23   :  { %204 = vmatpush3.msra.mxu0 %v63_v3 }
  0x24   :  { %205 = vmatprep.subr.mxu0 %v62_v5 }
  0x25   :  { %206 = vmatpush3.msra.mxu0 %v62_v5 }
  0x26   :  { %207 = vmatprep.subr.mxu0 %v61_v6 }
  0x27   :  { %208 = vmatpush3.msra.mxu0 %v61_v6 }
  0x28   :  { %209 = vmatprep.subr.mxu0 %v60_v7 }
  0x29   :  { %210 = vmatpush3.msra.mxu0 %v60_v7 }
  0x2a   :  { %211 = vmatprep.subr.mxu0 %v59_v8 }
  0x2b   :  { %212 = vmatpush3.msra.mxu0 %v59_v8 }
  0x2c   :  { %213 = vmatprep.subr.mxu0 %v58_v9 }
  0x2d   :  { %214 = vmatpush3.msra.mxu0 %v58_v9 }
  0x2e   :  { %215 = vmatprep.subr.mxu0 %v57_v10 }
  0x2f   :  { %216 = vmatpush3.msra.mxu0 %v57_v10 }
  0x30   :  { %217 = vmatprep.subr.mxu0 %v56_v11 }
  0x31   :  { %218 = vmatpush3.msra.mxu0 %v56_v11 }
  0x32   :  { %219 = vmatprep.subr.mxu0 %v55_v12 }
  0x33   :  { %220 = vmatpush3.msra.mxu0 %v55_v12 }
  0x34   :  { %221 = vmatprep.subr.mxu0 %v54_v13 }
  0x35   :  { %222 = vmatpush3.msra.mxu0 %v54_v13 }
  0x36   :  { %223 = vmatprep.subr.mxu0 %v53_v14 }
  0x37   :  { %224 = vmatpush3.msra.mxu0 %v53_v14 }
  0x38   :  { %225 = vmatprep.subr.mxu0 %v52_v15 }
  0x39   :  { %226 = vmatpush3.msra.mxu0 %v52_v15 }
  0x3a   :  { %227 = vmatprep.subr.mxu0 %v51_v16 }
  0x3b   :  { %228 = vmatpush3.msra.mxu0 %v51_v16 }
  0x3c   :  { %230 = vmatmul.mubr.f32.vlgmr.msra.gmra.mxu0 %v50_v17 }
  0xfc   :  { %v231_v18 = vpop.f32.mrf.mxu0 }
  0xfd   :  { %v146_v21 = vadd.f32 %v231_v18, %v177_v19 }
  0xfe   :  { %v140_v20 = vpop.f32.mrf.mxu0 }
  0xff   :  { %v141_v22 = vadd.f32 %v177_v19, %v140_v20  ;;  %v150_v25 = vmax.f32 %v146_v21, 0.0 }
 0x101   :  { %v149_v23 = vmax.f32 %v141_v22, 0.0  ;;  %v159_v27 = vmul.f32 %v178_v24, %v150_v25 }
 0x103   :  { %v158_v26 = vmul.f32 %v178_v24, %v149_v23 }
 0x105   :  { %160 = vadd.xlane.f32.xlu0 %v158_v26 }
 0x109   :  { %162 = vadd.xlane.f32.xlu0 %v159_v27 }
 0x18e   :  { %v161_v29 = vpop.xlane.xlu0 %160 }
 0x18f   :  { %v166_v30 = vadd.f32 %v165_v28, %v161_v29 }
 0x191   :  { %169 = vst.msk [vmem:[%s340_s5] sm:$0xff] %vm168_vm0, %v166_v30 }
 0x192   :  { %v163_v31 = vpop.xlane.xlu0 %162 }
 0x193   :  { %v167_v32 = vadd.f32 %v165_v28, %v163_v31 }
 0x195   :  { %170 = vst.msk [vmem:[%s340_s5 + $0x8] sm:$0xff] %vm168_vm0, %v167_v32 }
 0x196   :  { %175 = vsyncpa [#allocation4], 1 }
 0x197   :  { %176 = vsyncpa [#allocation6], 1 }

</bundles_post_ra>
